<compile_context>
chip_gen: v7x
topology: tpu7x:2x2x1
jax: 0.10.0
libtpu: 0.0.40
codegen_flags: <defaults>
</compile_context>

<pallas_src>
import jax
import jax.numpy as jnp
from jax.experimental import pallas as pl
from jax.experimental.pallas import tpu as pltpu

NUM_CLASSES = 3
_LANES = 128
_MAX_BLOCK_ROWS = 2048  # 2048 * 128 * 4 B = 1 MiB per buffer


def _stable_sigmoid(z):
    # sigmoid(z) with the exp argument always <= 0 (no overflow); exp -> EUP.
    e = jnp.exp(-jnp.abs(z))
    return jnp.where(z >= 0, 1.0 / (1.0 + e), e / (1.0 + e))


def _coral_kernel(bias_ref, x_ref, logits_ref, probas_ref):
    """bias_ref: SMEM (K-1,) f32 scalars (scalar-prefetched).

    x_ref / logits_ref / probas_ref: VMEM (block_rows, 128) f32 blocks of the
    flat, class-interleaved view of the (B, K-1) arrays, i.e. flat index
    f = b*(K-1) + k.  x has already been duplicated K-1 times per batch
    element in the wrapper, so the kernel is a dense add + sigmoid.
    """
    x = x_ref[...]                                  # (rows, 128), fully dense
    k1 = bias_ref.shape[0]                          # static (= num_classes-1)
    rows, lanes = x.shape

    # Class id of every element: class = global_flat_index % (K-1).
    base = pl.program_id(0) * rows * lanes          # block's flat offset
    r_idx = jax.lax.broadcasted_iota(jnp.int32, x.shape, 0)
    l_idx = jax.lax.broadcasted_iota(jnp.int32, x.shape, 1)
    cls = (base + r_idx * lanes + l_idx) % k1

    bias_pat = jnp.zeros(x.shape, jnp.float32)
    for k in range(k1):                             # static unroll, K-1 == 2
        bias_pat = jnp.where(cls == k, bias_ref[k], bias_pat)

    logits = x + bias_pat                           # one full-block VPU add
    logits_ref[...] = logits                        # whole-block dense vst
    probas_ref[...] = _stable_sigmoid(logits)       # whole-block dense vst


def _choose_block_rows(total_rows):
    """Pick a block height: multiple of 8, <= 1 MiB tile, >= 2 grid steps
    whenever there is enough data (v7x megacore)."""
    if total_rows <= 16:
        return total_rows                 # full-array block (allowed)
    half = pl.cdiv(total_rows, 2)
    half = ((half + 7) // 8) * 8          # sublane multiple
    return min(_MAX_BLOCK_ROWS, half)


@jax.jit
def coral_ordinal_forward(x, bias):
    """x: (B, 1), bias: (K-1,) -> (logits (B, K-1), probas (B, K-1)), f32."""
    B = x.shape[0]
    k1 = bias.shape[0]
    n = B * k1                                       # total output elements

    # Class-interleaved duplication of the (small) input:
    #   x_rep[b*(K-1)+k] = x[b]   -- exactly the row-major contiguous layout
    # of the (B, K-1) outputs, so the kernel never needs a transpose/swizzle.
    x_rep = jnp.repeat(x.astype(jnp.float32).reshape(B), k1)    # (B*(K-1),)

    rows = pl.cdiv(n, _LANES)
    padded = rows * _LANES
    if padded != n:                                  # lane padding only
        x_rep = jnp.pad(x_rep, (0, padded - n))
    x2d = x_rep.reshape(rows, _LANES)

    block_rows = _choose_block_rows(rows)
    grid = (pl.cdiv(rows, block_rows),)              # partial last block OK

    blk = pl.BlockSpec((block_rows, _LANES), lambda i, bias_ref: (i, 0))
    out_shape = (jax.ShapeDtypeStruct((rows, _LANES), jnp.float32),
                 jax.ShapeDtypeStruct((rows, _LANES), jnp.float32))

    logits2d, probas2d = pl.pallas_call(
        _coral_kernel,
        out_shape=out_shape,
        grid_spec=pltpu.PrefetchScalarGridSpec(
            num_scalar_prefetch=1,                   # bias -> SMEM
            grid=grid,
            in_specs=[blk],
            out_specs=(blk, blk),
        ),
        compiler_params=pltpu.CompilerParams(
            dimension_semantics=("parallel",)),      # shard rows across TCs
    )(bias.astype(jnp.float32), x2d)

    def unflatten(a):
        a = a.reshape(-1)
        if padded != n:
            a = a[:n]                                # only when lane-padded
        return a.reshape(B, k1)

    return unflatten(logits2d), unflatten(probas2d)


if __name__ == "__main__":
    key = jax.random.PRNGKey(0)

    # --- small shape consistent with the module (single tiny block) ---
    B = 8
    x = jax.random.normal(key, (B, 1), dtype=jnp.float32)
    bias = jnp.zeros((NUM_CLASSES - 1,), dtype=jnp.float32)  # PyTorch init

    logits, probas = coral_ordinal_forward(x, bias)
    jax.block_until_ready((logits, probas))

    ref_logits = x + bias[None, :]
    ref_probas = jax.nn.sigmoid(ref_logits)
    assert logits.shape == (B, NUM_CLASSES - 1)
    assert probas.shape == (B, NUM_CLASSES - 1)
    assert jnp.allclose(logits, ref_logits, atol=1e-6)
    assert jnp.allclose(probas, ref_probas, atol=1e-5)

    # --- multi-block, megacore-parallel path (still tiny data), nonzero bias ---
    ka, kb, kc = jax.random.split(jax.random.PRNGKey(1), 3)
    B2 = 4096
    x2 = jax.random.normal(ka, (B2, 1), dtype=jnp.float32)
    bias2 = jax.random.normal(kb, (NUM_CLASSES - 1,), dtype=jnp.float32)
    l2, p2 = coral_ordinal_forward(x2, bias2)
    jax.block_until_ready((l2, p2))
    ref_l2 = x2 + bias2[None, :]
    assert jnp.allclose(l2, ref_l2, atol=1e-6)
    assert jnp.allclose(p2, jax.nn.sigmoid(ref_l2), atol=1e-5)

    # --- batch not a multiple of 64: exercises lane padding + tail slice ---
    B3 = 100
    x3 = jax.random.normal(kc, (B3, 1), dtype=jnp.float32)
    l3, p3 = coral_ordinal_forward(x3, bias2)
    jax.block_until_ready((l3, p3))
    ref_l3 = x3 + bias2[None, :]
    assert jnp.allclose(l3, ref_l3, atol=1e-6)
    assert jnp.allclose(p3, jax.nn.sigmoid(ref_l3), atol=1e-5)

    print("KERNEL_OK")
</pallas_src>

<mosaic_0001>
module attributes {stable_mosaic.version = 11 : i64} {
  func.func @_coral_kernel(%arg0: i32, %arg1: memref<2xf32, #tpu.memory_space<smem>>, %arg2: memref<1x128xf32, #tpu.memory_space<vmem>>, %arg3: memref<1x128xf32, #tpu.memory_space<vmem>>, %arg4: memref<1x128xf32, #tpu.memory_space<vmem>>) attributes {dimension_semantics = [#tpu.dimension_semantics<parallel>], iteration_bounds = array<i64: 1>, scalar_prefetch = 1 : i64, scratch_operands = 0 : i64, tpu.core_type = #tpu.core_type<tc>, window_params = [{transform_indices = @transform_0, window_bounds = array<i64: 1, 128>}, {transform_indices = @transform_1, window_bounds = array<i64: 1, 128>}, {transform_indices = @transform_2, window_bounds = array<i64: 1, 128>}]} {
    %c0 = arith.constant 0 : index
    %c0_0 = arith.constant 0 : index
    %0 = vector.load %arg2[%c0, %c0_0] : memref<1x128xf32, #tpu.memory_space<vmem>>, vector<1x128xf32>
    %c1_i32 = arith.constant 1 : i32
    %1 = arith.muli %arg0, %c1_i32 : i32
    %c128_i32 = arith.constant 128 : i32
    %2 = arith.muli %1, %c128_i32 : i32
    %3 = tpu.iota {dimensions = array<i32: 0>} : vector<1x128xi32>
    %4 = tpu.iota {dimensions = array<i32: 1>} : vector<1x128xi32>
    %c128_i32_1 = arith.constant 128 : i32
    %5 = vector.broadcast %c128_i32_1 : i32 to vector<1x128xi32>
    %6 = arith.muli %3, %5 : vector<1x128xi32>
    %7 = vector.broadcast %2 : i32 to vector<1x128xi32>
    %8 = arith.addi %7, %6 : vector<1x128xi32>
    %9 = arith.addi %8, %4 : vector<1x128xi32>
    %c2_i32 = arith.constant 2 : i32
    %c0_i32 = arith.constant 0 : i32
    %10 = arith.cmpi eq, %c2_i32, %c0_i32 : i32
    %c1_i32_2 = arith.constant 1 : i32
    %11 = arith.select %10, %c1_i32_2, %c2_i32 : i32
    %12 = vector.broadcast %11 : i32 to vector<1x128xi32>
    %13 = arith.remsi %9, %12 : vector<1x128xi32>
    %c0_i32_3 = arith.constant 0 : i32
    %14 = vector.broadcast %c0_i32_3 : i32 to vector<1x128xi32>
    %15 = arith.cmpi ne, %13, %14 : vector<1x128xi32>
    %c0_i32_4 = arith.constant 0 : i32
    %16 = vector.broadcast %c0_i32_4 : i32 to vector<1x128xi32>
    %17 = arith.cmpi slt, %13, %16 : vector<1x128xi32>
    %c0_i32_5 = arith.constant 0 : i32
    %18 = arith.cmpi slt, %11, %c0_i32_5 : i32
    %19 = vector.broadcast %18 : i1 to vector<1x128xi1>
    %20 = vector.broadcast %19 : vector<1x128xi1> to vector<1x128xi1>
    %21 = arith.xori %17, %20 : vector<1x128xi1>
    %22 = arith.andi %21, %15 : vector<1x128xi1>
    %23 = vector.broadcast %11 : i32 to vector<1x128xi32>
    %24 = arith.addi %13, %23 : vector<1x128xi32>
    %25 = arith.select %22, %24, %13 : vector<1x128xi1>, vector<1x128xi32>
    %cst = arith.constant 0.000000e+00 : f32
    %26 = vector.broadcast %cst : f32 to vector<1x128xf32>
    %c0_i32_6 = arith.constant 0 : i32
    %27 = vector.broadcast %c0_i32_6 : i32 to vector<1x128xi32>
    %28 = arith.cmpi eq, %25, %27 : vector<1x128xi32>
    %c0_7 = arith.constant 0 : index
    %29 = memref.load %arg1[%c0_7] : memref<2xf32, #tpu.memory_space<smem>>
    %30 = vector.broadcast %29 : f32 to vector<1x128xf32>
    %31 = arith.select %28, %30, %26 : vector<1x128xi1>, vector<1x128xf32>
    %c1_i32_8 = arith.constant 1 : i32
    %32 = vector.broadcast %c1_i32_8 : i32 to vector<1x128xi32>
    %33 = arith.cmpi eq, %25, %32 : vector<1x128xi32>
    %c1 = arith.constant 1 : index
    %34 = memref.load %arg1[%c1] : memref<2xf32, #tpu.memory_space<smem>>
    %35 = vector.broadcast %34 : f32 to vector<1x128xf32>
    %36 = arith.select %33, %35, %31 : vector<1x128xi1>, vector<1x128xf32>
    %37 = arith.addf %0, %36 : vector<1x128xf32>
    %c0_9 = arith.constant 0 : index
    %c0_10 = arith.constant 0 : index
    %38 = vector.load %arg3[%c0_9, %c0_10] : memref<1x128xf32, #tpu.memory_space<vmem>>, vector<1x128xf32>
    tpu.vector_store %arg3[%c0_9, %c0_10], %37 {strides = array<i32>} : memref<1x128xf32, #tpu.memory_space<vmem>>, vector<1x128xf32>,
    %39 = math.absf %37 : vector<1x128xf32>
    %cst_11 = arith.constant 0.000000e+00 : f32
    %40 = vector.broadcast %cst_11 : f32 to vector<1x128xf32>
    %41 = arith.subf %40, %39 : vector<1x128xf32>
    %42 = math.exp %41 : vector<1x128xf32>
    %cst_12 = arith.constant 0.000000e+00 : f32
    %43 = vector.broadcast %cst_12 : f32 to vector<1x128xf32>
    %44 = arith.cmpf oge, %37, %43 : vector<1x128xf32>
    %cst_13 = arith.constant 1.000000e+00 : f32
    %45 = vector.broadcast %cst_13 : f32 to vector<1x128xf32>
    %46 = arith.addf %45, %42 : vector<1x128xf32>
    %cst_14 = arith.constant 1.000000e+00 : f32
    %47 = vector.broadcast %cst_14 : f32 to vector<1x128xf32>
    %48 = arith.divf %47, %46 : vector<1x128xf32>
    %cst_15 = arith.constant 1.000000e+00 : f32
    %49 = vector.broadcast %cst_15 : f32 to vector<1x128xf32>
    %50 = arith.addf %49, %42 : vector<1x128xf32>
    %51 = arith.divf %42, %50 : vector<1x128xf32>
    %52 = arith.select %44, %48, %51 : vector<1x128xi1>, vector<1x128xf32>
    %c0_16 = arith.constant 0 : index
    %c0_17 = arith.constant 0 : index
    %53 = vector.load %arg4[%c0_16, %c0_17] : memref<1x128xf32, #tpu.memory_space<vmem>>, vector<1x128xf32>
    tpu.vector_store %arg4[%c0_16, %c0_17], %52 {strides = array<i32>} : memref<1x128xf32, #tpu.memory_space<vmem>>, vector<1x128xf32>,
    return
  }
  func.func @transform_0(%arg0: i32, %arg1: memref<2xf32, #tpu.memory_space<smem>>) -> (i32, i32) {
    %c0_i32 = arith.constant 0 : i32
    %c0_i32_0 = arith.constant 0 : i32
    return %arg0, %c0_i32 : i32, i32
  }
  func.func @transform_1(%arg0: i32, %arg1: memref<2xf32, #tpu.memory_space<smem>>) -> (i32, i32) {
    %c0_i32 = arith.constant 0 : i32
    %c0_i32_0 = arith.constant 0 : i32
    return %arg0, %c0_i32 : i32, i32
  }
  func.func @transform_2(%arg0: i32, %arg1: memref<2xf32, #tpu.memory_space<smem>>) -> (i32, i32) {
    %c0_i32 = arith.constant 0 : i32
    %c0_i32_0 = arith.constant 0 : i32
    return %arg0, %c0_i32 : i32, i32
  }
}

</mosaic_0001>

<bundles_post_ra>
// kernel: coral_ordinal_forward.1
= control target key start
LH: loop header
LB: loop body
LE: loop exit
PB: predicated region body
PF: predicated region fallthrough
CT: control target
= control target key end

     0   :  { %s122_s0 = inlined_call_operand.vmem [shape: f32[2], index: 0, kind: input, shape index: {}]   ;;  %s123_s1 = inlined_call_operand.vmem [shape: f32[1,128], index: 1, kind: input, shape index: {}]   ;;  %s124_s2 = inlined_call_operand.vmem [shape: f32[1,128], index: 2, kind: output, shape index: {0}]   ;;  %s125_s3 = inlined_call_operand.vmem [shape: f32[1,128], index: 3, kind: output, shape index: {1}]  }
   0x1   :  { %s9_s14 = sshll.u32 %s122_s0, 4  ;;  %s10_s14 = int_to_ptr.vmem [resolvable:$true] %s9_s14 }
   0x2   :  { %s75_s15 = scalar_lea.vmem %s10_s14, 16  ;;  %p80_p1 = scmp.lt.s32.totalorder %s10_s14, %s10_s14 }
   0x3   :  { %p76_p0 = scmp.ne.s32.totalorder %s10_s14, %s75_s15  ;;  %p81_p2 = scmp.lt.s32.totalorder %s75_s15, %s75_s15 }
   0x5   :  { %p82_p3 = por %p81_p2, %p80_p1 }
   0x7   :  { %p83_p4 = pnand %p82_p3, %p76_p0 }
   0x9   :  { %86 = shalt.err (!%p83_p4)  }
   0xa   :  { %s89_s16 = smov [#allocation3]  }
   0xb   :  { %12 = dma.vmem_to_smem %s10_s14, 16, %s89_s16, [#allocation2] }
   0xc   :  { %87 = dma.done.wait [#allocation2], 16 }
   0xd   :  { %88 = vsyncadd [#allocation2], 4294967280 }
   0xe   :  { %14 = sfence }
   0xf   :  { %v19_v0 = vlaneseq  ;;  %s40_s0 = sld [smem:[#allocation3]]  ;;  %s69_s17 = sld [smem:[#allocation3 + $0x1]]  ;;  %v17_v14 = vld [vmem:[%s123_s1] sm:$0x1] }
  0x11   :  { %v20_v1 = vshrl.u32 %v19_v0, 7  ;;  %v22_v2 = vand.u32 127, %v19_v0 }
  0x13   :  { %v23_v3 = vmul.u32 128, %v20_v1 }
  0x15   :  { %v26_v4 = vadd.s32 %v23_v3, %v22_v2  ;;  %v41_v11 = vstv %s40_s0  ;;  %v45_v13 = vstv %s69_s17 }
  0x17   :  { %v28_v5 = vsub.s32 0, %v26_v4  ;;  %vm27_vm0 = vcmp.lt.s32.totalorder %v26_v4, 0 }
  0x19   :  { %v68_v6 = vmin.u32 %v28_v5, %v26_v4 }
  0x1b   :  { %v31_v7 = vand.u32 1, %v68_v6 }
  0x1d   :  { %v32_v8 = vsub.s32 0, %v31_v7 }
  0x1f   :  { %v33_v9 = vsel %vm27_vm0, %v32_v8, %v31_v7 }
  0x20   :  { %vm34_vm1 = vcmp.ne.s32.totalorder %v33_v9, 0  ;;  %vm35_vm2 = vcmp.lt.s32.totalorder %v33_v9, 0  ;;  %v37_v10 = vadd.s32 2, %v33_v9 }
  0x21   :  { %vm36_vm3 = vmand %vm35_vm2, %vm34_vm1 }
  0x22   :  { %v38_v12 = vsel %vm36_vm3, %v37_v10, %v33_v9 }
  0x23   :  { %vm39_vm4 = vcmp.eq.s32.totalorder %v38_v12, 0  ;;  %vm43_vm5 = vcmp.eq.s32.totalorder %v38_v12, 1 }
  0x24   :  { %v42_v15 = vsel %vm39_vm4, %v41_v11, 0.0 }
  0x25   :  { %v46_v16 = vsel %vm43_vm5, %v45_v13, %v42_v15 }
  0x26   :  { %v47_v17 = vadd.f32 %v46_v16, %v17_v14 }
  0x28   :  { %48 = vst [vmem:[%s124_s2] sm:$0x1] %v47_v17  ;;  %v49_v18 = vand.u32 2147483647, %v47_v17  ;;  %vm53_vm6 = vcmp.ge.f32.partialorder %v47_v17, 0.0 }
  0x2a   :  { %v50_v19 = vsub.f32 0.0, %v49_v18 }
  0x2c   :  { %v51_v20 = vmul.f32 1.442695, %v50_v19 }
  0x2e   :  { %71 = vpow2.f32 %v51_v20 }
  0x38   :  { %v72_v21 = vpop.eup %71 }
  0x39   :  { %v54_v22 = vadd.f32 1.0, %v72_v21 }
  0x3b   :  { %73 = vrcp.f32 %v54_v22 }
  0x45   :  { %v74_v23 = vpop.eup %73 }
  0x46   :  { %v57_v24 = vmul.f32 %v74_v23, %v72_v21 }
  0x48   :  { %v58_v25 = vsel %vm53_vm6, %v74_v23, %v57_v24 }
  0x49   :  { %59 = vst [vmem:[%s125_s3] sm:$0x1] %v58_v25 }

</bundles_post_ra>
